<compile_context>
chip_gen: v7x
topology: tpu7x:2x2x1
jax: 0.10.0
libtpu: 0.0.40
codegen_flags: <defaults>
</compile_context>

<pallas_src>
import functools

import jax
import jax.numpy as jnp
from jax.experimental import pallas as pl
from jax.experimental.pallas import tpu as pltpu


def _basic_block_kernel(xv_ref, w1_ref, b1_ref, w2_ref, b2_ref, out_ref,
                        y1v_ref, *, NB, H, WC):
    """Fused BasicBlock for NB images (lane-dense layout, last dim = W*C).

    xv_ref  : (NB, H+2, WC) bf16  input rows, 1 zero row top/bottom (vert. pad)
    w1_ref  : (3, WC, WC)   bf16  conv1 banded weights (BN1 scale folded)
    b1_ref  : (1, WC)       f32   BN1 shift, tiled over W
    w2_ref  : (3, WC, WC)   bf16  conv2 banded weights (BN2 scale folded)
    b2_ref  : (1, WC)       f32   BN2 shift, tiled over W
    out_ref : (NB, H, WC)         lane-dense output
    y1v_ref : (NB, H+2, WC) bf16  VMEM scratch: conv1 output, vertically padded
    """
    Hp = H + 2
    f32 = jnp.float32

    def banded_conv(src_ref, w_ref):
        # One MXU matmul per kernel row dy; horizontal padding is inside the
        # band; vertical padding is the zero top/bottom row of src_ref.
        acc = jnp.dot(src_ref[:, 0:H, :].reshape(NB * H, WC), w_ref[0],
                      preferred_element_type=f32)
        for dy in (1, 2):
            acc = acc + jnp.dot(src_ref[:, dy:dy + H, :].reshape(NB * H, WC),
                                w_ref[dy], preferred_element_type=f32)
        return acc                                             # (NB*H, WC) f32

    # ---- conv1 + BN1 (scale folded into w1) + ReLU --------------------------
    y1 = jnp.maximum(banded_conv(xv_ref, w1_ref) + b1_ref[...], 0.0)

    # ---- stage conv1 output in VMEM (bf16 MXU operand), vertical zero pad ---
    # Only the two pad rows are zeroed (full-lane stores); no full-scratch zero.
    y1v_ref[:, 1:H + 1, :] = y1.reshape(NB, H, WC).astype(y1v_ref.dtype)
    y1v_ref[:, 0:1, :] = jnp.zeros((NB, 1, WC), y1v_ref.dtype)
    y1v_ref[:, Hp - 1:Hp, :] = jnp.zeros((NB, 1, WC), y1v_ref.dtype)

    # ---- conv2 + BN2 (scale folded into w2), fed straight from VMEM ---------
    acc2 = banded_conv(y1v_ref, w2_ref)

    # ---- BN2 shift + residual (= centre of xv, already in VMEM) + ReLU ------
    res = xv_ref[:, 1:H + 1, :].reshape(NB * H, WC).astype(f32)
    out = jnp.maximum(acc2 + b2_ref[...] + res, 0.0)
    out_ref[...] = out.reshape(NB, H, WC).astype(out_ref.dtype)


def _fold_bn(gamma, beta, mean, var, eps=1e-5):
    scale = gamma / jnp.sqrt(var + eps)
    return scale, beta - mean * scale


def _make_banded_weights(w_hwio, W):
    """(3,3,Cin,Cout) HWIO weights -> (3, W*Cin, W*Cout) block-Toeplitz bands.

    Band dy maps a lane-dense input row (W*Cin) to a lane-dense output row
    (W*Cout).  Horizontal zero-padding is handled by truncating the band at
    the image edges (entries outside [0, W) are simply absent).
    """
    bands = []
    for dy in range(3):
        band = None
        for dx in range(3):
            # input position p contributes to output position w iff p = w+dx-1
            shift = jnp.eye(W, k=1 - dx, dtype=jnp.float32)
            blk = jnp.kron(shift, w_hwio[dy, dx].astype(jnp.float32))
            band = blk if band is None else band + blk
        bands.append(band)
    return jnp.stack(bands, axis=0).astype(jnp.bfloat16)


def basic_block_forward(x_nchw, params, *, eps=1e-5, out_dtype=jnp.bfloat16,
                        images_per_step=None):
    """BasicBlock forward (stride=1, downsample=None). Input NCHW, output NCHW."""
    N, C, H, W = x_nchw.shape
    assert params["w1"].shape == (C, C, 3, 3), "needs inplanes == planes (stride=1)"
    WC = W * C
    Hp = H + 2

    # ---- one-time weight/bias prep in XLA (fold BN scale, build bands) ------
    s1, b1 = _fold_bn(params["g1"], params["be1"], params["m1"], params["v1"], eps)
    s2, b2 = _fold_bn(params["g2"], params["be2"], params["m2"], params["v2"], eps)
    w1_hwio = jnp.transpose(params["w1"], (2, 3, 1, 0)) * s1      # OIHW->HWIO, *scale
    w2_hwio = jnp.transpose(params["w2"], (2, 3, 1, 0)) * s2
    w1b = _make_banded_weights(w1_hwio, W)                        # (3, WC, WC) bf16
    w2b = _make_banded_weights(w2_hwio, W)
    b1t = jnp.tile(b1, W).reshape(1, WC).astype(jnp.float32)      # lane-dense shift
    b2t = jnp.tile(b2, W).reshape(1, WC).astype(jnp.float32)

    # ---- activations: lane-dense rows (N, H, W*C), one zero row top/bottom --
    x_nhwc = jnp.transpose(x_nchw, (0, 2, 3, 1))
    xv = jnp.pad(x_nhwc.reshape(N, H, WC),
                 ((0, 0), (1, 1), (0, 0))).astype(jnp.bfloat16)   # (N, Hp, WC)

    out_itemsize = jnp.dtype(out_dtype).itemsize

    # ---- images per grid step: keep >=2 steps (v7x 2 TCs), pack more for big N
    if images_per_step is None:
        NB = 1
        if N > 2:
            per_image = (2 * Hp * WC * 2 + 2 * H * WC * out_itemsize + Hp * WC * 2)
            budget = 4 * 1024 * 1024
            for cand in range(2, N // 2 + 1):
                if N % cand == 0 and cand * per_image <= budget:
                    NB = cand
    else:
        NB = int(images_per_step)
    assert N % NB == 0, "images_per_step must divide the batch"
    grid = (N // NB,)

    # ---- VMEM budget: generation-aware clamp (~80% of physical VMEM) --------
    weight_bytes = 2 * 3 * WC * WC * 2 + 2 * WC * 4               # bands (bf16) + biases (f32)
    block_bytes = (2 * NB * Hp * WC * 2                           # dbl-buffered input (bf16)
                   + 2 * NB * H * WC * out_itemsize               # dbl-buffered output
                   + 2 * weight_bytes                             # resident weights (conservative)
                   + NB * Hp * WC * 2)                            # y1 staging scratch (bf16)
    try:
        vmem_cap = pltpu.get_tpu_info().vmem_capacity_bytes
    except Exception:
        vmem_cap = 64 * 1024 * 1024                               # v7x per-core lower bound
    vmem_limit = int(min(max(2 * block_bytes, 8 * 1024 * 1024), int(0.8 * vmem_cap)))

    kernel = functools.partial(_basic_block_kernel, NB=NB, H=H, WC=WC)

    out = pl.pallas_call(
        kernel,
        grid=grid,
        in_specs=[
            pl.BlockSpec((NB, Hp, WC), lambda n: (n, 0, 0)),      # padded input rows
            pl.BlockSpec((3, WC, WC), lambda n: (0, 0, 0)),       # w1 bands (resident)
            pl.BlockSpec((1, WC), lambda n: (0, 0)),              # b1 (tiled)
            pl.BlockSpec((3, WC, WC), lambda n: (0, 0, 0)),       # w2 bands (resident)
            pl.BlockSpec((1, WC), lambda n: (0, 0)),              # b2 (tiled)
        ],
        out_specs=pl.BlockSpec((NB, H, WC), lambda n: (n, 0, 0)),
        out_shape=jax.ShapeDtypeStruct((N, H, WC), out_dtype),
        scratch_shapes=[
            pltpu.VMEM((NB, Hp, WC), jnp.bfloat16),               # vert-padded conv1 output
        ],
        compiler_params=pltpu.CompilerParams(
            dimension_semantics=("parallel",),                    # v7x: shard images over 2 TCs
            vmem_limit_bytes=vmem_limit),
    )(xv, w1b, b1t, w2b, b2t)

    out = out.reshape(N, H, W, C)                                 # free (row-major)
    return jnp.transpose(out, (0, 3, 1, 2))                       # back to NCHW


def _reference_forward(x_nchw, params, eps=1e-5):
    """Pure-JAX (XLA, f32) reference for correctness checking."""
    def conv(x, w):
        return jax.lax.conv_general_dilated(
            x, w, window_strides=(1, 1), padding=((1, 1), (1, 1)),
            dimension_numbers=("NCHW", "OIHW", "NCHW"))

    def bn(x, g, be, m, v):
        s = (g / jnp.sqrt(v + eps)).reshape(1, -1, 1, 1)
        b = (be - m * g / jnp.sqrt(v + eps)).reshape(1, -1, 1, 1)
        return x * s + b

    out = jnp.maximum(bn(conv(x_nchw, params["w1"]), params["g1"],
                         params["be1"], params["m1"], params["v1"]), 0.0)
    out = bn(conv(out, params["w2"]), params["g2"],
             params["be2"], params["m2"], params["v2"])
    return jnp.maximum(out + x_nchw, 0.0)


if __name__ == "__main__":
    key = jax.random.PRNGKey(0)
    ks = jax.random.split(key, 11)

    # Small shapes: stride=1 & downsample=None require inplanes == planes.
    # W*C = 128 makes the lane-dense rows exactly one full vreg lane width.
    N, C, H, W = 2, 8, 16, 16
    planes = C

    x = jax.random.normal(ks[0], (N, C, H, W), jnp.float32)

    params = {
        # conv weights in PyTorch OIHW layout
        "w1": jax.random.normal(ks[1], (planes, C, 3, 3), jnp.float32) * 0.1,
        "w2": jax.random.normal(ks[2], (planes, planes, 3, 3), jnp.float32) * 0.1,
        # bn1
        "g1": jax.random.uniform(ks[3], (planes,), jnp.float32, 0.5, 1.5),
        "be1": jax.random.normal(ks[4], (planes,), jnp.float32) * 0.1,
        "m1": jax.random.normal(ks[5], (planes,), jnp.float32) * 0.1,
        "v1": jax.random.uniform(ks[6], (planes,), jnp.float32, 0.5, 1.5),
        # bn2
        "g2": jax.random.uniform(ks[7], (planes,), jnp.float32, 0.5, 1.5),
        "be2": jax.random.normal(ks[8], (planes,), jnp.float32) * 0.1,
        "m2": jax.random.normal(ks[9], (planes,), jnp.float32) * 0.1,
        "v2": jax.random.uniform(ks[10], (planes,), jnp.float32, 0.5, 1.5),
    }

    out = jax.block_until_ready(basic_block_forward(x, params))
    ref = jax.block_until_ready(_reference_forward(x, params))

    assert out.shape == (N, planes, H, W)
    # bf16 MXU operands, bf16 staging/residual/output vs pure-f32 ref -> loose tol.
    out_f32 = out.astype(jnp.float32)
    max_err = float(jnp.max(jnp.abs(out_f32 - ref)))
    assert jnp.allclose(out_f32, ref, rtol=5e-2, atol=5e-2), f"max abs err {max_err}"

    print("KERNEL_OK")
</pallas_src>

<mosaic_0001>
module attributes {stable_mosaic.version = 11 : i64} {
  func.func @_basic_block_kernel(%arg0: i32, %arg1: memref<1x18x128xbf16, #tpu.memory_space<vmem>>, %arg2: memref<3x128x128xbf16, #tpu.memory_space<vmem>>, %arg3: memref<1x128xf32, #tpu.memory_space<vmem>>, %arg4: memref<3x128x128xbf16, #tpu.memory_space<vmem>>, %arg5: memref<1x128xf32, #tpu.memory_space<vmem>>, %arg6: memref<1x16x128xbf16, #tpu.memory_space<vmem>>, %arg7: memref<1x18x128xbf16, #tpu.memory_space<vmem>>) attributes {dimension_semantics = [#tpu.dimension_semantics<parallel>], iteration_bounds = array<i64: 2>, scalar_prefetch = 0 : i64, scratch_operands = 1 : i64, tpu.core_type = #tpu.core_type<tc>, window_params = [{transform_indices = @transform_0, window_bounds = array<i64: 1, 18, 128>}, {pipeline_mode = #tpu.pipeline_mode<synchronous>, transform_indices = @transform_1, window_bounds = array<i64: 3, 128, 128>}, {pipeline_mode = #tpu.pipeline_mode<synchronous>, transform_indices = @transform_2, window_bounds = array<i64: 1, 128>}, {pipeline_mode = #tpu.pipeline_mode<synchronous>, transform_indices = @transform_3, window_bounds = array<i64: 3, 128, 128>}, {pipeline_mode = #tpu.pipeline_mode<synchronous>, transform_indices = @transform_4, window_bounds = array<i64: 1, 128>}, {transform_indices = @transform_5, window_bounds = array<i64: 1, 16, 128>}]} {
    %c0 = arith.constant 0 : index
    %c0_0 = arith.constant 0 : index
    %c0_1 = arith.constant 0 : index
    %0 = vector.load %arg1[%c0, %c0_0, %c0_1] : memref<1x18x128xbf16, #tpu.memory_space<vmem>>, vector<1x16x128xbf16>
    %1 = vector.shape_cast %0 : vector<1x16x128xbf16> to vector<16x128xbf16>
    %c0_2 = arith.constant 0 : index
    %c0_3 = arith.constant 0 : index
    %c0_4 = arith.constant 0 : index
    %2 = vector.load %arg2[%c0_2, %c0_3, %c0_4] : memref<3x128x128xbf16, #tpu.memory_space<vmem>>, vector<1x128x128xbf16>
    %3 = vector.shape_cast %2 : vector<1x128x128xbf16> to vector<128x128xbf16>
    %cst = arith.constant dense<0.000000e+00> : vector<16x128xf32>
    %4 = tpu.matmul %1, %3, %cst {dimension_numbers = #tpu.dot_dimension_numbers<[1], [0], [0], [1], [0, 0, 1, 1], [], []>} : vector<16x128xbf16>, vector<128x128xbf16>, vector<16x128xf32> -> vector<16x128xf32>
    %c0_5 = arith.constant 0 : index
    %c1 = arith.constant 1 : index
    %c0_6 = arith.constant 0 : index
    %5 = vector.load %arg1[%c0_5, %c1, %c0_6] : memref<1x18x128xbf16, #tpu.memory_space<vmem>>, vector<1x16x128xbf16>
    %6 = vector.shape_cast %5 : vector<1x16x128xbf16> to vector<16x128xbf16>
    %c1_7 = arith.constant 1 : index
    %c0_8 = arith.constant 0 : index
    %c0_9 = arith.constant 0 : index
    %7 = vector.load %arg2[%c1_7, %c0_8, %c0_9] : memref<3x128x128xbf16, #tpu.memory_space<vmem>>, vector<1x128x128xbf16>
    %8 = vector.shape_cast %7 : vector<1x128x128xbf16> to vector<128x128xbf16>
    %cst_10 = arith.constant dense<0.000000e+00> : vector<16x128xf32>
    %9 = tpu.matmul %6, %8, %cst_10 {dimension_numbers = #tpu.dot_dimension_numbers<[1], [0], [0], [1], [0, 0, 1, 1], [], []>} : vector<16x128xbf16>, vector<128x128xbf16>, vector<16x128xf32> -> vector<16x128xf32>
    %10 = arith.addf %4, %9 : vector<16x128xf32>
    %c0_11 = arith.constant 0 : index
    %c2 = arith.constant 2 : index
    %c0_12 = arith.constant 0 : index
    %11 = vector.load %arg1[%c0_11, %c2, %c0_12] : memref<1x18x128xbf16, #tpu.memory_space<vmem>>, vector<1x16x128xbf16>
    %12 = vector.shape_cast %11 : vector<1x16x128xbf16> to vector<16x128xbf16>
    %c2_13 = arith.constant 2 : index
    %c0_14 = arith.constant 0 : index
    %c0_15 = arith.constant 0 : index
    %13 = vector.load %arg2[%c2_13, %c0_14, %c0_15] : memref<3x128x128xbf16, #tpu.memory_space<vmem>>, vector<1x128x128xbf16>
    %14 = vector.shape_cast %13 : vector<1x128x128xbf16> to vector<128x128xbf16>
    %cst_16 = arith.constant dense<0.000000e+00> : vector<16x128xf32>
    %15 = tpu.matmul %12, %14, %cst_16 {dimension_numbers = #tpu.dot_dimension_numbers<[1], [0], [0], [1], [0, 0, 1, 1], [], []>} : vector<16x128xbf16>, vector<128x128xbf16>, vector<16x128xf32> -> vector<16x128xf32>
    %16 = arith.addf %10, %15 : vector<16x128xf32>
    %c0_17 = arith.constant 0 : index
    %c0_18 = arith.constant 0 : index
    %17 = vector.load %arg3[%c0_17, %c0_18] : memref<1x128xf32, #tpu.memory_space<vmem>>, vector<1x128xf32>
    %18 = vector.broadcast %17 : vector<1x128xf32> to vector<16x128xf32>
    %19 = arith.addf %16, %18 : vector<16x128xf32>
    %cst_19 = arith.constant 0.000000e+00 : f32
    %20 = vector.broadcast %cst_19 : f32 to vector<16x128xf32>
    %21 = arith.maximumf %19, %20 : vector<16x128xf32>
    %22 = vector.shape_cast %21 : vector<16x128xf32> to vector<1x16x128xf32>
    %23 = arith.truncf %22 : vector<1x16x128xf32> to vector<1x16x128xbf16>
    %c0_20 = arith.constant 0 : index
    %c1_21 = arith.constant 1 : index
    %c0_22 = arith.constant 0 : index
    %24 = vector.load %arg7[%c0_20, %c1_21, %c0_22] : memref<1x18x128xbf16, #tpu.memory_space<vmem>>, vector<1x16x128xbf16>
    tpu.vector_store %arg7[%c0_20, %c1_21, %c0_22], %23 {strides = array<i32>} : memref<1x18x128xbf16, #tpu.memory_space<vmem>>, vector<1x16x128xbf16>,
    %cst_23 = arith.constant 0.000000e+00 : bf16
    %25 = vector.broadcast %cst_23 : bf16 to vector<1x1x128xbf16>
    %c0_24 = arith.constant 0 : index
    %c0_25 = arith.constant 0 : index
    %c0_26 = arith.constant 0 : index
    %26 = vector.load %arg7[%c0_24, %c0_25, %c0_26] : memref<1x18x128xbf16, #tpu.memory_space<vmem>>, vector<1x1x128xbf16>
    tpu.vector_store %arg7[%c0_24, %c0_25, %c0_26], %25 {strides = array<i32>} : memref<1x18x128xbf16, #tpu.memory_space<vmem>>, vector<1x1x128xbf16>,
    %cst_27 = arith.constant 0.000000e+00 : bf16
    %27 = vector.broadcast %cst_27 : bf16 to vector<1x1x128xbf16>
    %c0_28 = arith.constant 0 : index
    %c17 = arith.constant 17 : index
    %c0_29 = arith.constant 0 : index
    %28 = vector.load %arg7[%c0_28, %c17, %c0_29] : memref<1x18x128xbf16, #tpu.memory_space<vmem>>, vector<1x1x128xbf16>
    tpu.vector_store %arg7[%c0_28, %c17, %c0_29], %27 {strides = array<i32>} : memref<1x18x128xbf16, #tpu.memory_space<vmem>>, vector<1x1x128xbf16>,
    %c0_30 = arith.constant 0 : index
    %c0_31 = arith.constant 0 : index
    %c0_32 = arith.constant 0 : index
    %29 = vector.load %arg7[%c0_30, %c0_31, %c0_32] : memref<1x18x128xbf16, #tpu.memory_space<vmem>>, vector<1x16x128xbf16>
    %30 = vector.shape_cast %29 : vector<1x16x128xbf16> to vector<16x128xbf16>
    %c0_33 = arith.constant 0 : index
    %c0_34 = arith.constant 0 : index
    %c0_35 = arith.constant 0 : index
    %31 = vector.load %arg4[%c0_33, %c0_34, %c0_35] : memref<3x128x128xbf16, #tpu.memory_space<vmem>>, vector<1x128x128xbf16>
    %32 = vector.shape_cast %31 : vector<1x128x128xbf16> to vector<128x128xbf16>
    %cst_36 = arith.constant dense<0.000000e+00> : vector<16x128xf32>
    %33 = tpu.matmul %30, %32, %cst_36 {dimension_numbers = #tpu.dot_dimension_numbers<[1], [0], [0], [1], [0, 0, 1, 1], [], []>} : vector<16x128xbf16>, vector<128x128xbf16>, vector<16x128xf32> -> vector<16x128xf32>
    %c0_37 = arith.constant 0 : index
    %c1_38 = arith.constant 1 : index
    %c0_39 = arith.constant 0 : index
    %34 = vector.load %arg7[%c0_37, %c1_38, %c0_39] : memref<1x18x128xbf16, #tpu.memory_space<vmem>>, vector<1x16x128xbf16>
    %35 = vector.shape_cast %34 : vector<1x16x128xbf16> to vector<16x128xbf16>
    %c1_40 = arith.constant 1 : index
    %c0_41 = arith.constant 0 : index
    %c0_42 = arith.constant 0 : index
    %36 = vector.load %arg4[%c1_40, %c0_41, %c0_42] : memref<3x128x128xbf16, #tpu.memory_space<vmem>>, vector<1x128x128xbf16>
    %37 = vector.shape_cast %36 : vector<1x128x128xbf16> to vector<128x128xbf16>
    %cst_43 = arith.constant dense<0.000000e+00> : vector<16x128xf32>
    %38 = tpu.matmul %35, %37, %cst_43 {dimension_numbers = #tpu.dot_dimension_numbers<[1], [0], [0], [1], [0, 0, 1, 1], [], []>} : vector<16x128xbf16>, vector<128x128xbf16>, vector<16x128xf32> -> vector<16x128xf32>
    %39 = arith.addf %33, %38 : vector<16x128xf32>
    %c0_44 = arith.constant 0 : index
    %c2_45 = arith.constant 2 : index
    %c0_46 = arith.constant 0 : index
    %40 = vector.load %arg7[%c0_44, %c2_45, %c0_46] : memref<1x18x128xbf16, #tpu.memory_space<vmem>>, vector<1x16x128xbf16>
    %41 = vector.shape_cast %40 : vector<1x16x128xbf16> to vector<16x128xbf16>
    %c2_47 = arith.constant 2 : index
    %c0_48 = arith.constant 0 : index
    %c0_49 = arith.constant 0 : index
    %42 = vector.load %arg4[%c2_47, %c0_48, %c0_49] : memref<3x128x128xbf16, #tpu.memory_space<vmem>>, vector<1x128x128xbf16>
    %43 = vector.shape_cast %42 : vector<1x128x128xbf16> to vector<128x128xbf16>
    %cst_50 = arith.constant dense<0.000000e+00> : vector<16x128xf32>
    %44 = tpu.matmul %41, %43, %cst_50 {dimension_numbers = #tpu.dot_dimension_numbers<[1], [0], [0], [1], [0, 0, 1, 1], [], []>} : vector<16x128xbf16>, vector<128x128xbf16>, vector<16x128xf32> -> vector<16x128xf32>
    %45 = arith.addf %39, %44 : vector<16x128xf32>
    %c0_51 = arith.constant 0 : index
    %c1_52 = arith.constant 1 : index
    %c0_53 = arith.constant 0 : index
    %46 = vector.load %arg1[%c0_51, %c1_52, %c0_53] : memref<1x18x128xbf16, #tpu.memory_space<vmem>>, vector<1x16x128xbf16>
    %47 = vector.shape_cast %46 : vector<1x16x128xbf16> to vector<16x128xbf16>
    %48 = arith.extf %47 : vector<16x128xbf16> to vector<16x128xf32>
    %c0_54 = arith.constant 0 : index
    %c0_55 = arith.constant 0 : index
    %49 = vector.load %arg5[%c0_54, %c0_55] : memref<1x128xf32, #tpu.memory_space<vmem>>, vector<1x128xf32>
    %50 = vector.broadcast %49 : vector<1x128xf32> to vector<16x128xf32>
    %51 = arith.addf %45, %50 : vector<16x128xf32>
    %52 = arith.addf %51, %48 : vector<16x128xf32>
    %cst_56 = arith.constant 0.000000e+00 : f32
    %53 = vector.broadcast %cst_56 : f32 to vector<16x128xf32>
    %54 = arith.maximumf %52, %53 : vector<16x128xf32>
    %55 = vector.shape_cast %54 : vector<16x128xf32> to vector<1x16x128xf32>
    %56 = arith.truncf %55 : vector<1x16x128xf32> to vector<1x16x128xbf16>
    %c0_57 = arith.constant 0 : index
    %c0_58 = arith.constant 0 : index
    %c0_59 = arith.constant 0 : index
    %57 = vector.load %arg6[%c0_57, %c0_58, %c0_59] : memref<1x16x128xbf16, #tpu.memory_space<vmem>>, vector<1x16x128xbf16>
    tpu.vector_store %arg6[%c0_57, %c0_58, %c0_59], %56 {strides = array<i32>} : memref<1x16x128xbf16, #tpu.memory_space<vmem>>, vector<1x16x128xbf16>,
    return
  }
  func.func @transform_0(%arg0: i32) -> (i32, i32, i32) {
    %c0_i32 = arith.constant 0 : i32
    %c0_i32_0 = arith.constant 0 : i32
    %c0_i32_1 = arith.constant 0 : i32
    return %arg0, %c0_i32, %c0_i32_0 : i32, i32, i32
  }
  func.func @transform_1(%arg0: i32) -> (i32, i32, i32) {
    %c0_i32 = arith.constant 0 : i32
    %c0_i32_0 = arith.constant 0 : i32
    %c0_i32_1 = arith.constant 0 : i32
    %c0_i32_2 = arith.constant 0 : i32
    return %c0_i32, %c0_i32_0, %c0_i32_1 : i32, i32, i32
  }
  func.func @transform_2(%arg0: i32) -> (i32, i32) {
    %c0_i32 = arith.constant 0 : i32
    %c0_i32_0 = arith.constant 0 : i32
    %c0_i32_1 = arith.constant 0 : i32
    return %c0_i32, %c0_i32_0 : i32, i32
  }
  func.func @transform_3(%arg0: i32) -> (i32, i32, i32) {
    %c0_i32 = arith.constant 0 : i32
    %c0_i32_0 = arith.constant 0 : i32
    %c0_i32_1 = arith.constant 0 : i32
    %c0_i32_2 = arith.constant 0 : i32
    return %c0_i32, %c0_i32_0, %c0_i32_1 : i32, i32, i32
  }
  func.func @transform_4(%arg0: i32) -> (i32, i32) {
    %c0_i32 = arith.constant 0 : i32
    %c0_i32_0 = arith.constant 0 : i32
    %c0_i32_1 = arith.constant 0 : i32
    return %c0_i32, %c0_i32_0 : i32, i32
  }
  func.func @transform_5(%arg0: i32) -> (i32, i32, i32) {
    %c0_i32 = arith.constant 0 : i32
    %c0_i32_0 = arith.constant 0 : i32
    %c0_i32_1 = arith.constant 0 : i32
    return %arg0, %c0_i32, %c0_i32_0 : i32, i32, i32
  }
}

</mosaic_0001>

<bundles_post_ra>
// kernel: tpu_custom_call.1
= control target key start
LH: loop header
LB: loop body
LE: loop exit
PB: predicated region body
PF: predicated region fallthrough
CT: control target
= control target key end

     0   :  { %10 = vsyncpa [#allocation4], 0  ;;  %s1971_s0 = inlined_call_operand.vmem [shape: bf16[2,18,128], index: 0, kind: input, shape index: {}]   ;;  %s1972_s1 = inlined_call_operand.hbm [shape: bf16[3,128,128], index: 1, kind: input, shape index: {}]   ;;  %s1973_s2 = inlined_call_operand.vmem [shape: f32[1,128], index: 2, kind: input, shape index: {}]   ;;  %s1974_s3 = inlined_call_operand.hbm [shape: bf16[3,128,128], index: 3, kind: input, shape index: {}]   ;;  %s1975_s4 = inlined_call_operand.vmem [shape: f32[1,128], index: 4, kind: input, shape index: {}]   ;;  %s1976_s5 = inlined_call_operand.hbm [shape: bf16[2,16,128], index: 5, kind: output, shape index: {}]  }
   0x1   :  { %11 = vsyncpa [#allocation7], 0 }
   0x2   :  { %12 = vsyncpa [#allocation5], 0 }
   0x3   :  { %14 = vsyncpa [#allocation5 + $0x1], 0  ;;  %s1708_s18 = smov 0   ;;  %s1710_s19 = smov 0  }
   0x4   :  { %s1712_s20 = smov 0   ;;  %s1714_s21 = smov 0  }
   0x5 LB: > { %s1729_s22 = sadd.s32 4294967295, %s1667_s21   ;;  %s1157_s23 = sadd.s32 4294967294, %s1667_s21   ;;  %s1667_s21 = sphi %s1714_s21, %s1994_s21   ;;  %s1663_s20 = sphi %s1712_s20, %s1993_s20   ;;  %s1659_s19 = sphi %s1710_s19, %s1992_s19   ;;  %s1655_s18 = sphi %s1708_s18, %s1991_s18  }
   0x6   : > { %s1733_s24 = sadd.s32 1, %s1667_s21   ;;  %s137_s25 = sadd.s32 1, %s1663_s20 }
   0x7   : > { %s134_s26 = ssub.s32 %s1667_s21, %s1733_s24  ;;  %p147_p0 = scmp.ne.s32.totalorder %s1663_s20, %s1659_s19 }
   0x8   : > { %p135_p1 = scmp.eq.s32.totalorder %s134_s26, 0  ;;  %p148_p2 = scmp.eq.s32.totalorder %s1729_s22, 1 }
   0x9   : > { %p153_p3 = scmp.ne.s32.totalorder %s1659_s19, %s1655_s18  ;;  %p154_p4 = scmp.eq.s32.totalorder %s1157_s23, 1 }
   0xa   : > { %s1744_s27 = scalar_select %p135_p1, %s1663_s20, %s137_s25  }
   0xb   : > { %p1746_p5 = por %p148_p2, %p147_p0  ;;  %p1750_p6 = por %p154_p4, %p153_p3 }
   0xc   : > { %p1158_p7 = scmp.ge.s32.totalorder %s1667_s21, 1  ;;  %p161_p8 = scmp.lt.s32.totalorder %s1667_s21, 3 }
   0xd   : > { %s1980_s28 = scalar_select %p1746_p5, 1, 0 }
   0xe   : > { %s1981_s29 = scalar_select %p1750_p6, 1, 0 }
   0xf   : > { %p1977_p9 = scmp.eq.s32.totalorder %s1729_s22, 0  ;;  %p1757_p10 = pnand %p1158_p7, %p161_p8 }
  0x10   : > { %s1669_s6 = smov [#allocation3]   ;;  %s1670_s9 = smov [#allocation6]  }
  0x11   : > { %s1982_s30 = scalar_select %p1757_p10, 1, 0 }
  0x12   : > { %s173_s7 = sshll.u32 %s1669_s6, 4  ;;  %p1431_p11 = pneg %p1757_p10  ;;  %s174_s7 = int_to_ptr.vmem [resolvable:$true] %s173_s7 }
  0x13   : > { %s189_s10 = sshll.u32 %s1670_s9, 4  ;;  %s1541_s13 = scalar_lea.hbm %s1972_s1, 3072  ;;  %s1769_s10 = int_to_ptr.vmem [resolvable:$true] %s189_s10 }
  0x14   : > { %p1765_p12 = pnand %p1977_p9, %p1431_p11  ;;  %p1542_p13 = scmp.ne.s32.totalorder %s1972_s1, %s1541_s13 }
  0x15   : > { %p1548_p3 = scmp.lt.u32.totalorder %s1541_s13, %s1972_s1 }
  0x16   : > { %p1543_p0 = pneg %p1765_p12 }
  0x18   : > { %p1544_p1 = pnand %p1543_p0, %p1542_p13 }
  0x1a   : > { %p1545_p2 = pneg %p1544_p1 }
  0x1c   : > { %p1550_p4 = pnand %p1548_p3, %p1545_p2 }
  0x1e   : > { %1553 = shalt.err (!%p1550_p4)
}
  0x1f   : > { %s1554_s23 = scalar_lea.vmem %s174_s7, 3072  ;;  %p1562_p9 = scmp.lt.s32.totalorder %s174_s7, %s174_s7 }
  0x20   : > { %p1555_p7 = scmp.ne.s32.totalorder %s174_s7, %s1554_s23  ;;  %p1563_p6 = scmp.lt.s32.totalorder %s1554_s23, %s1554_s23 }
  0x22   : > { %p1557_p8 = pnand %p1555_p7, %p1543_p0  ;;  %p1564_p5 = por %p1563_p6, %p1562_p9 }
  0x24   : > { %p1558_p11 = pneg %p1557_p8 }
  0x26   : > { %p1565_p10 = pnand %p1564_p5, %p1558_p11 }
  0x28   : > { %1568 = shalt.err (!%p1565_p10)
}
  0x29   : > { %s1671_s25 = smov 64   ;;  %s1672_s26 = smov 4  }
  0x2a   : > { %1434 = dma.hbm_to_vmem [thread:$0]  (!%p1765_p12), %s1972_s1, 3072, %s174_s7, [#allocation4], %s1671_s25, %s1671_s25, %s1672_s26  }
  0x2b   : > { %s1569_s13 = scalar_lea.hbm %s1974_s3, 3072 }
  0x2c   : > { %p1570_p13 = scmp.ne.s32.totalorder %s1974_s3, %s1569_s13  ;;  %p1576_p9 = scmp.lt.u32.totalorder %s1569_s13, %s1974_s3 }
  0x2e   : > { %p1572_p5 = pnand %p1570_p13, %p1543_p0 }
  0x30   : > { %p1573_p6 = pneg %p1572_p5 }
  0x32   : > { %p1578_p10 = pnand %p1576_p9, %p1573_p6 }
  0x34   : > { %1581 = shalt.err (!%p1578_p10)
}
  0x35   : > { %s1582_s7 = scalar_lea.vmem %s1769_s10, 3072  ;;  %p1590_p4 = scmp.lt.s32.totalorder %s1769_s10, %s1769_s10 }
  0x36   : > { %p1583_p1 = scmp.ne.s32.totalorder %s1769_s10, %s1582_s7  ;;  %p1591_p7 = scmp.lt.s32.totalorder %s1582_s7, %s1582_s7 }
  0x38   : > { %p1585_p2 = pnand %p1583_p1, %p1543_p0  ;;  %p1592_p8 = por %p1591_p7, %p1590_p4 }
  0x3a   : > { %p1586_p3 = pneg %p1585_p2 }
  0x3c   : > { %p1593_p11 = pnand %p1592_p8, %p1586_p3 }
  0x3e   : > { %1596 = shalt.err (!%p1593_p11)
}
  0x3f   : > { %1437 = dma.hbm_to_vmem [thread:$0]  (!%p1765_p12), %s1974_s3, 3072, %s1769_s10, [#allocation7], %s1671_s25, %s1671_s25, %s1672_s26  }
  0x40   : > { %p1984_p13 = scmp.ne.s32.totalorder %s1982_s30, 0 }
  0x41   : > { %p1985_p5 = scmp.eq.s32.totalorder (!%p1984_p13), %s1729_s22, 0 }
  0x42   : > { %216 = sbr.rel (%p1984_p13) target bundleno = 668 (0x29c), region = 40 }
  0x49   : > { %1642 = dma.done.wait (%p1985_p5), [#allocation4], 3072   ;;  %p1986_p0 = pmov %p1985_p5 }
  0x4b   : > { %1644 = vsyncadd (%p1986_p0), [#allocation4], 4294964224  ;;  %p1987_p6 = pmov %p1986_p0 }
  0x4c   : > { %p1988_p9 = pmov %p1986_p0 }
  0x4d   : > { %1646 = dma.done.wait (%p1987_p6), [#allocation7], 3072  }
  0x4e   : > { %1648 = vsyncadd (%p1988_p9), [#allocation7], 4294964224  ;;  %v1673_v0 = vmov 0.0   ;;  %vm1674_vm0 = vmmov 0   ;;  %v1487_v1 = vld [vmem:[#allocation3 + $0x40] sm:$0xff]   ;;  %p248_p12 = scmp.lt.s32.totalorder %s1729_s22, 1 }
  0x4f   : > { %1300 = vmatprep.subr.bf16.mxu0 %v1673_v0  ;;  %1320 = vmatprep.subr.bf16.mxu1 %v1673_v0  ;;  %v1488_v2 = vld [vmem:[#allocation3] sm:$0xff]   ;;  %v1489_v3 = vld [vmem:[#allocation3 + $0x48] sm:$0xff]   ;;  %v1491_v5 = vld [vmem:[#allocation3 + $0x50] sm:$0xff]   ;;  %vm298_vm1 = vsmask.f32 7424  ;;  %vm512_vm2 = vcmask 1046528  }
  0x50   : > { %1316 = vmatprep.mubr.msk.bf16.mxu0 %vm1674_vm0, %v1673_v0  ;;  %1336 = vmatprep.mubr.msk.bf16.mxu1 %vm1674_vm0, %v1673_v0  ;;  %v1490_v4 = vld [vmem:[#allocation3 + $0x8] sm:$0xff]   ;;  %s249_s30 = scalar_select %p248_p12, %s1729_s22, 1  ;;  %v1492_v6 = vld [vmem:[#allocation3 + $0x10] sm:$0xff]   ;;  %v1493_v7 = vld [vmem:[#allocation3 + $0x58] sm:$0xff]   ;;  %vm648_vm3 = vcmask 1043456   ;;  %vm655_vm7 = vcmask 1040384  }
  0x51   : > { %1301 = vmatpush3.bf16.msra.mxu0 %v1487_v1  ;;  %1321 = vmatpush3.bf16.msra.mxu1 %v1488_v2  ;;  %v1494_v8 = vld [vmem:[#allocation3 + $0x18] sm:$0xff]   ;;  %v1495_v9 = vld [vmem:[#allocation3 + $0x60] sm:$0xff]   ;;  %v1497_v13 = vld [vmem:[#allocation3 + $0x68] sm:$0xff]   ;;  %vm649_vm4 = vsmask.f32 7938  ;;  %s245_s12 = sand.u32 1, %s1659_s19  }
  0x52   : > { %1302 = vmatprep.subr.bf16.mxu0 %v1673_v0  ;;  %1322 = vmatprep.subr.bf16.mxu1 %v1673_v0  ;;  %s1420_s8 = smul.u32 12, %s249_s30  ;;  %v1496_v10 = vld [vmem:[#allocation3 + $0x20] sm:$0xff]   ;;  %v1498_v16 = vld [vmem:[#allocation3 + $0x28] sm:$0xff]   ;;  %v1499_v18 = vld [vmem:[#allocation3 + $0x70] sm:$0xff]   ;;  %vm625_vm5 = vsmask.f32 256 }
  0x53   : > { %v1500_v22 = vld [vmem:[#allocation3 + $0x30] sm:$0xff]   ;;  %v1501_v23 = vld [vmem:[#allocation3 + $0x78] sm:$0xff]   ;;  %v1505_v27 = vld [vmem:[#allocation3 + $0x80] sm:$0xff]   ;;  %vm626_vm6 = vsmask.f32 4368  ;;  %s1165_s15 = sshll.u32 %s245_s12, 3 }
  0x54   : > { %s1845_s26 = scalar_lea.vmem %s1971_s0, %s1420_s8  ;;  %v1502_v24 = vld [vmem:[#allocation3 + $0x38] sm:$0xff]   ;;  %v1506_v29 = vld [vmem:[#allocation3 + $0x88] sm:$0xff]   ;;  %v1507_v30 = vld [vmem:[#allocation3 + $0x90] sm:$0xff]   ;;  %s1236_s16 = sshll.u32 %s1729_s22, 7 }
  0x55   : > { %1303 = vmatpush3.bf16.msra.mxu0 %v1489_v3  ;;  %1323 = vmatpush3.bf16.msra.mxu1 %v1490_v4  ;;  %v254_v11 = vld [vmem:[%s1845_s26] sm:$0xf]  ;;  %v255_v12 = vld [vmem:[%s1845_s26 + $0x4] sm:$0xf]  ;;  %v1509_v32 = vld [vmem:[#allocation3 + $0xa0] sm:$0xff]   ;;  %s247_s17 = scalar_lea.vmem [#allocation8], %s1165_s15  ;;  %s1926_s30 = scalar_lea.hbm %s1976_s5, %s1236_s16 }
  0x56   : > { %1304 = vmatprep.subr.bf16.mxu0 %v1673_v0  ;;  %1324 = vmatprep.subr.bf16.mxu1 %v1673_v0  ;;  %v1167_v14 = vcombine.low %v254_v11, %v255_v12  ;;  %v1852_v15 = vld [vmem:[%s1845_s26 + $0x8] ss:$0 sps:$4 sm:$0x11]   ;;  %v1510_v33 = vld [vmem:[#allocation3 + $0xa8] sm:$0xff]   ;;  %v491_v34 = vld [vmem:[%s1845_s26] sm:$0xe] }
  0x57   : > { %v307_v21 = vshll.u32 %v1852_v15, 16  ;;  %v1508_v31 = vld [vmem:[#allocation3 + $0x98] sm:$0xff]   ;;  %v1511_v35 = vld [vmem:[#allocation3 + $0xb0] sm:$0xff]   ;;  %v1185_v36 = vcombine.low %v491_v34, %v255_v12  ;;  %v514_v39 = vrot.slane %v1852_v15, 1  ;;  %v1514_v41 = vld [vmem:[#allocation6] sm:$0xff]   ;;  %s1073_s7 = sshll.u32 %s247_s17, 4  ;;  %s1928_s7 = int_to_ptr.vmem [resolvable:$true] %s1073_s7 }
  0x58   : > { %v302_v17 = vshll.u32 %v1167_v14, 16  ;;  %v300_v19 = vshrl.u32 %v1167_v14, 16  ;;  %v1512_v37 = vld [vmem:[#allocation3 + $0xb8] sm:$0xff]   ;;  %v1515_v42 = vld [vmem:[#allocation6 + $0x8] sm:$0xff]   ;;  %v1516_v43 = vld [vmem:[#allocation6 + $0x40] sm:$0xff]   ;;  %s1930_s8 = scalar_lea.sflag [#allocation5], %s245_s12 }
  0x59   : > { %1305 = vmatpush3.bf16.msra.mxu0 %v1491_v5  ;;  %1325 = vmatpush3.bf16.msra.mxu1 %v1492_v6  ;;  %v309_v25 = vrot.slane %v307_v21, 1  ;;  %v513_v38 = vrot.slane %v1185_v36, 1  ;;  %v1517_v44 = vld [vmem:[#allocation6 + $0x10] sm:$0xff]   ;;  %v1518_v45 = vld [vmem:[#allocation6 + $0x48] sm:$0xff]   ;;  %v1519_v46 = vld [vmem:[#allocation6 + $0x18] sm:$0xff]   ;;  %s1597_s10 = scalar_lea.vmem %s1928_s7, 128 }
  0x5a   : > { %1306 = vmatprep.subr.bf16.mxu0 %v1673_v0  ;;  %1326 = vmatprep.subr.bf16.mxu1 %v1673_v0  ;;  %v304_v20 = vrot.slane %v302_v17, 1  ;;  %v1520_v47 = vld [vmem:[#allocation6 + $0x50] sm:$0xff]   ;;  %v1521_v48 = vld [vmem:[#allocation6 + $0x20] sm:$0xff]   ;;  %v1522_v49 = vld [vmem:[#allocation6 + $0x58] sm:$0xff]   ;;  %p1598_p10 = scmp.ne.s32.totalorder %s1928_s7, %s1597_s10  ;;  %p1989_p1 = scmp.ne.s32.totalorder %s1980_s28, 0 }
  0x5b   : > { %v515_v40 = vsel %vm512_vm2, %v513_v38, %v514_v39  ;;  %v1523_v50 = vld [vmem:[#allocation6 + $0x28] sm:$0xff]   ;;  %v1524_v51 = vld [vmem:[#allocation6 + $0x60] sm:$0xff]   ;;  %v1525_v52 = vld [vmem:[#allocation6 + $0x30] sm:$0xff]   ;;  %s1675_s22 = smov [#allocation8]  }
  0x5c   : > { %v305_v26 = vor.u32 %v304_v20, %v300_v19  ;;  %v1526_v53 = vld [vmem:[#allocation6 + $0x68] sm:$0xff]   ;;  %v1527_v54 = vld [vmem:[#allocation6 + $0x38] sm:$0xff]   ;;  %v1528_v55 = vld [vmem:[#allocation6 + $0x70] sm:$0xff]   ;;  %p1599_p2 = pnand %p1598_p10, %p1989_p1  ;;  %s1601_s25 = sshll.u32 %s1675_s22, 4  ;;  %s1602_s25 = int_to_ptr.vmem [resolvable:$false] %s1601_s25 }
  0x5d   : > { %1307 = vmatpush3.bf16.msra.mxu0 %v1493_v7  ;;  %1327 = vmatpush3.bf16.msra.mxu1 %v1494_v8  ;;  %v1530_v56 = vld [vmem:[#allocation6 + $0x78] sm:$0xff]   ;;  %v1194_v5 = vld [vmem:[%s1973_s2] ss:$0 sm:$0xff]  ;;  %vm650_vm8 = vmand %vm648_vm3, %vm649_vm4  ;;  %p1604_p4 = scmp.lt.s32.totalorder %s1928_s7, %s1602_s25 }
  0x5e   : > { %1308 = vmatprep.subr.bf16.mxu0 %v1673_v0  ;;  %1328 = vmatprep.subr.bf16.mxu1 %v1673_v0  ;;  %v310_v28 = vsel %vm298_vm1, %v305_v26, %v309_v25  ;;  %v651_v21 = vld [vmem:[#allocation2] sm:$0xf]  ;;  %vm627_vm9 = vmor %vm625_vm5, %vm626_vm6  ;;  %v657_v25 = vld [vmem:[#allocation2 + $0x8] sm:$0x1]  ;;  %p1600_p3 = pneg %p1599_p2 }
  0x5f   : > { %vm656_vm10 = vmand %vm655_vm7, %vm625_vm5 }
  0x60   : > { %vm663_vm11 = vmand %vm655_vm7, %vm649_vm4 }
  0x61   : > { %1309 = vmatpush3.bf16.msra.mxu0 %v1495_v9  ;;  %1329 = vmatpush3.bf16.msra.mxu1 %v1496_v10 }
  0x62   : > { %1310 = vmatprep.subr.bf16.mxu0 %v1673_v0  ;;  %1330 = vmatprep.subr.bf16.mxu1 %v1673_v0 }
  0x65   : > { %1311 = vmatpush3.bf16.msra.mxu0 %v1497_v13  ;;  %1331 = vmatpush3.bf16.msra.mxu1 %v1498_v16 }
  0x66   : > { %1312 = vmatprep.subr.bf16.mxu0 %v1673_v0  ;;  %1332 = vmatprep.subr.bf16.mxu1 %v1673_v0 }
  0x69   : > { %1313 = vmatpush3.bf16.msra.mxu0 %v1499_v18  ;;  %1333 = vmatpush3.bf16.msra.mxu1 %v1500_v22 }
  0x6a   : > { %1314 = vmatprep.subr.bf16.mxu0 %v1673_v0  ;;  %1334 = vmatprep.subr.bf16.mxu1 %v1673_v0 }
  0x6d   : > { %1315 = vmatpush3.bf16.msra.mxu0 %v1501_v23  ;;  %1335 = vmatpush3.bf16.msra.mxu1 %v1502_v24 }
  0x6e   : > { %1340 = vmatprep.subr.bf16.mxu0 %v1673_v0  ;;  %1360 = vmatprep.subr.bf16.mxu1 %v1673_v0 }
  0x70   : > { %1317 = vmatmul.mubr.bf16.vlgmr.msra.gmra.mrb[0].mxu0 %v310_v28  ;;  %1337 = vmatmul.mubr.bf16.vlgmr.msra.gmra.mrb[0].mxu1 %v1167_v14 }
  0x71   : > { %1341 = vmatpush3.bf16.msra.mxu0 %v1505_v27  ;;  %1356 = vmatprep.mubr.msk.bf16.mxu0 %vm1674_vm0, %v1673_v0 }
  0x72   : > { %1342 = vmatprep.subr.bf16.mxu0 %v1673_v0  ;;  %1376 = vmatprep.mubr.msk.bf16.mxu1 %vm1674_vm0, %v1673_v0 }
  0x73   : > { %1361 = vmatpush3.bf16.msra.mxu1 %v1516_v43 }
  0x74   : > { %1362 = vmatprep.subr.bf16.mxu1 %v1673_v0 }
  0x75   : > { %1343 = vmatpush3.bf16.msra.mxu0 %v1506_v29 }
  0x76   : > { %1344 = vmatprep.subr.bf16.mxu0 %v1673_v0 }
  0x77   : > { %1363 = vmatpush3.bf16.msra.mxu1 %v1518_v45 }
  0x78   : > { %1364 = vmatprep.subr.bf16.mxu1 %v1673_v0 }
  0x79   : > { %1345 = vmatpush3.bf16.msra.mxu0 %v1507_v30 }
  0x7a   : > { %1346 = vmatprep.subr.bf16.mxu0 %v1673_v0 }
  0x7b   : > { %1365 = vmatpush3.bf16.msra.mxu1 %v1520_v47 }
  0x7c   : > { %1366 = vmatprep.subr.bf16.mxu1 %v1673_v0 }
  0x7d   : > { %1347 = vmatpush3.bf16.msra.mxu0 %v1508_v31 }
  0x7e   : > { %1348 = vmatprep.subr.bf16.mxu0 %v1673_v0 }
  0x7f   : > { %1367 = vmatpush3.bf16.msra.mxu1 %v1522_v49  ;;  %v1534_v49 = vld [vmem:[#allocation6 + $0x90] sm:$0xff]  }
  0x80   : > { %1368 = vmatprep.subr.bf16.mxu1 %v1673_v0 }
  0x81   : > { %1349 = vmatpush3.bf16.msra.mxu0 %v1509_v32 }
  0x82   : > { %1350 = vmatprep.subr.bf16.mxu0 %v1673_v0 }
  0x83   : > { %1369 = vmatpush3.bf16.msra.mxu1 %v1524_v51  ;;  %v1536_v51 = vld [vmem:[#allocation6 + $0xa0] sm:$0xff]  }
  0x84   : > { %1370 = vmatprep.subr.bf16.mxu1 %v1673_v0 }
  0x85   : > { %1351 = vmatpush3.bf16.msra.mxu0 %v1510_v33 }
  0x86   : > { %1352 = vmatprep.subr.bf16.mxu0 %v1673_v0 }
  0x87   : > { %1371 = vmatpush3.bf16.msra.mxu1 %v1526_v53  ;;  %v1538_v53 = vld [vmem:[#allocation6 + $0xb0] sm:$0xff]  }
  0x88   : > { %1372 = vmatprep.subr.bf16.mxu1 %v1673_v0 }
  0x89   : > { %1353 = vmatpush3.bf16.msra.mxu0 %v1511_v35 }
  0x8a   : > { %1354 = vmatprep.subr.bf16.mxu0 %v1673_v0 }
  0x8b   : > { %1373 = vmatpush3.bf16.msra.mxu1 %v1528_v55  ;;  %v1539_v55 = vld [vmem:[#allocation6 + $0xb8] sm:$0xff]  }
  0x8c   : > { %1374 = vmatprep.subr.bf16.mxu1 %v1673_v0 }
  0x8d   : > { %1355 = vmatpush3.bf16.msra.mxu0 %v1512_v37 }
  0x8e   : > { %1380 = vmatprep.subr.bf16.mxu0 %v1673_v0 }
  0x8f   : > { %1375 = vmatpush3.bf16.msra.mxu1 %v1530_v56 }
  0x90   : > { %1357 = vmatmul.mubr.bf16.vlgmr.msra.gmra.mrb[4].mxu0 %v515_v40  ;;  %1400 = vmatprep.subr.bf16.mxu1 %v1673_v0 }
  0x91   : > { %1396 = vmatprep.mubr.msk.bf16.mxu0 %vm1674_vm0, %v1673_v0  ;;  %1381 = vmatpush3.bf16.msra.mxu0 %v1514_v41 }
  0x92   : > { %1382 = vmatprep.subr.bf16.mxu0 %v1673_v0 }
  0x95   : > { %1383 = vmatpush3.bf16.msra.mxu0 %v1515_v42 }
  0x96   : > { %1384 = vmatprep.subr.bf16.mxu0 %v1673_v0 }
  0x99   : > { %1385 = vmatpush3.bf16.msra.mxu0 %v1517_v44 }
  0x9a   : > { %1386 = vmatprep.subr.bf16.mxu0 %v1673_v0 }
  0x9d   : > { %1387 = vmatpush3.bf16.msra.mxu0 %v1519_v46  ;;  %v1532_v46 = vld [vmem:[#allocation6 + $0x80] sm:$0xff]  }
  0x9e   : > { %1388 = vmatprep.subr.bf16.mxu0 %v1673_v0 }
  0xa1   : > { %1389 = vmatpush3.bf16.msra.mxu0 %v1521_v48  ;;  %v1533_v48 = vld [vmem:[#allocation6 + $0x88] sm:$0xff]  }
  0xa2   : > { %1390 = vmatprep.subr.bf16.mxu0 %v1673_v0 }
  0xa5   : > { %1391 = vmatpush3.bf16.msra.mxu0 %v1523_v50  ;;  %v1535_v50 = vld [vmem:[#allocation6 + $0x98] sm:$0xff]  }
  0xa6   : > { %1392 = vmatprep.subr.bf16.mxu0 %v1673_v0 }
  0xa9   : > { %1393 = vmatpush3.bf16.msra.mxu0 %v1525_v52  ;;  %v1537_v52 = vld [vmem:[#allocation6 + $0xa8] sm:$0xff]  }
  0xaa   : > { %1394 = vmatprep.subr.bf16.mxu0 %v1673_v0 }
  0xad   : > { %1395 = vmatpush3.bf16.msra.mxu0 %v1527_v54 }
 0x143   : > { %v394_v57 = vpop.f32.mrb[0].mxu0  ;;  %v484_v58 = vpop.f32.mrb[0].mxu1 }
 0x144   : > { %v1318_v59 = vpop.f32.mrb[1].mxu0  ;;  %v485_v60 = vadd.f32 %v484_v58, %v394_v57  ;;  %v1338_v61 = vpop.f32.mrb[1].mxu1 }
 0x145   : > { %v397_v62 = vpop.f32.mrb[2].mxu0  ;;  %v487_v63 = vpop.f32.mrb[2].mxu1 }
 0x146   : > { %v1319_v1 = vpop.f32.mrb[3].mxu0  ;;  %v488_v2 = vadd.f32 %v487_v63, %v397_v62  ;;  %v1339_v3 = vpop.f32.mrb[3].mxu1 }
 0x163   : > { %v599_v4 = vpop.f32.mrb[4].mxu0 }
 0x164   : > { %v606_v6 = vadd.f32 %v599_v4, %v485_v60  ;;  %v1358_v7 = vpop.f32.mrb[5].mxu0 }
 0x165   : > { %v602_v8 = vpop.f32.mrb[6].mxu0  ;;  %v1021_v7 = vld [vmem:[%s1845_s26 + $0x8] sm:$0x1] }
 0x166   : > { %v615_v9 = vadd.f32 %v1194_v5, %v606_v6  ;;  %v607_v10 = vadd.f32 %v602_v8, %v488_v2  ;;  %v1359_v11 = vpop.f32.mrb[7].mxu0 }
 0x168   : > { %v617_v12 = vmax.f32 %v615_v9, 0.0  ;;  %v616_v13 = vadd.f32 %v1194_v5, %v607_v10  ;;  %v1024_v10 = vunpack.c.l.bf16 %v1021_v7 }
 0x16a   : > { %v1232_v14 = vpack.c.bf16 %v617_v12, %v617_v12  ;;  %v618_v15 = vmax.f32 %v616_v13, 0.0 }
 0x16c   : > { %v629_v16 = vshrl.u32 %v1232_v14, 16  ;;  %v1233_v17 = vpack.c.bf16 %v618_v15, %v618_v15  ;;  %v632_v19 = vshll.u32 %v1232_v14, 16  ;;  %v1224_v14 = vld [vmem:[%s1975_s4] ss:$0 sm:$0xff]  ;;  %v1041_v15 = vrot.slane %v1024_v10, 1 }
 0x16e   : > { %v631_v18 = vrot.slane %v629_v16, 7  ;;  %v637_v20 = vshrl.u32 %v1233_v17, 16  ;;  %v640_v24 = vshll.u32 %v1233_v17, 16 }
 0x170   : > { %v634_v22 = vor.u32 %v632_v19, %v631_v18  ;;  %v639_v23 = vrot.slane %v637_v20, 7  ;;  %v635_v26 = vrot.slane %v631_v18, 4 }
 0x172   : > { %v652_v27 = vsel %vm650_vm8, %v634_v22, %v651_v21  ;;  %v642_v28 = vor.u32 %v640_v24, %v639_v23  ;;  %v644_v29 = vrot.slane %v639_v23, 4 }
 0x173   : > { %653 = vst [vmem:[#allocation2] sm:$0xf] %v652_v27 }
 0x174   : > { %v643_v30 = vsel %vm627_vm9, %v635_v26, %v642_v28  ;;  %v658_v31 = vsel %vm656_vm10, %v644_v29, %v657_v25 }
 0x175   : > { %654 = vst [vmem:[#allocation2 + $0x4] sm:$0xf] %v643_v30  ;;  %659 = vst [vmem:[#allocation2 + $0x8] sm:$0x1] %v658_v31 }
 0x17a   : > { %v660_v32 = vld [vmem:[#allocation2] sm:$0x1]  ;;  %v903_v54 = vld [vmem:[#allocation2] sm:$0xe] }
 0x17b   : > { %v661_v33 = vsel %vm656_vm10, 0, %v660_v32 }
 0x17c   : > { %662 = vst [vmem:[#allocation2] sm:$0x1] %v661_v33  ;;  %v664_v34 = vld [vmem:[#allocation2 + $0x8] sm:$0x1]  ;;  %v668_v37 = vld [vmem:[#allocation2 + $0x4] sm:$0xf] }
 0x17d   : > { %v665_v35 = vsel %vm663_vm11, 0, %v664_v34  ;;  %v1215_v56 = vcombine.low %v903_v54, %v668_v37 }
 0x17e   : > { %666 = vst [vmem:[#allocation2 + $0x8] sm:$0x1] %v665_v35 }
 0x17f   : > { %v924_v58 = vrot.slane %v1215_v56, 1 }
 0x183   : > { %v667_v36 = vld [vmem:[#allocation2] sm:$0xf] }
 0x184   : > { %v1197_v38 = vcombine.low %v667_v36, %v668_v37 }
 0x185   : > { %v1531_v39 = vld [vmem:[#allocation2 + $0x8] ss:$0 sps:$4 sm:$0x11]  }
 0x186   : > { %1397 = vmatmul.mubr.bf16.vlgmr.msra.gmra.mrb[8].mxu0 %v1197_v38  ;;  %v714_v40 = vshll.u32 %v1197_v38, 16  ;;  %v719_v41 = vshll.u32 %v1531_v39, 16  ;;  %v712_v42 = vshrl.u32 %v1197_v38, 16  ;;  %v925_v57 = vrot.slane %v1531_v39, 1 }
 0x188   : > { %v716_v43 = vrot.slane %v714_v40, 1  ;;  %v721_v44 = vrot.slane %v719_v41, 1  ;;  %v926_v59 = vsel %vm512_vm2, %v924_v58, %v925_v57 }
 0x18a   : > { %v717_v45 = vor.u32 %v716_v43, %v712_v42 }
 0x18c   : > { %v722_v47 = vsel %vm298_vm1, %v717_v45, %v721_v44 }
 0x18d   : > { %1377 = vmatmul.mubr.bf16.vlgmr.msra.gmra.mrb[4].mxu1 %v722_v47 }
 0x18e   : > { %1401 = vmatpush3.bf16.msra.mxu1 %v1532_v46  ;;  %1416 = vmatprep.mubr.msk.bf16.mxu1 %vm1674_vm0, %v1673_v0 }
 0x18f   : > { %1402 = vmatprep.subr.bf16.mxu1 %v1673_v0 }
 0x192   : > { %1403 = vmatpush3.bf16.msra.mxu1 %v1533_v48 }
 0x193   : > { %1404 = vmatprep.subr.bf16.mxu1 %v1673_v0 }
 0x196   : > { %1405 = vmatpush3.bf16.msra.mxu1 %v1534_v49 }
 0x197   : > { %1406 = vmatprep.subr.bf16.mxu1 %v1673_v0 }
 0x19a   : > { %1407 = vmatpush3.bf16.msra.mxu1 %v1535_v50 }
 0x19b   : > { %1408 = vmatprep.subr.bf16.mxu1 %v1673_v0 }
 0x19e   : > { %1409 = vmatpush3.bf16.msra.mxu1 %v1536_v51 }
 0x19f   : > { %1410 = vmatprep.subr.bf16.mxu1 %v1673_v0 }
 0x1a2   : > { %1411 = vmatpush3.bf16.msra.mxu1 %v1537_v52 }
 0x1a3   : > { %1412 = vmatprep.subr.bf16.mxu1 %v1673_v0 }
 0x1a6   : > { %1413 = vmatpush3.bf16.msra.mxu1 %v1538_v53 }
 0x1a7   : > { %1414 = vmatprep.subr.bf16.mxu1 %v1673_v0  ;;  %v1238_v0 = vld [vmem:[%s1845_s26] sm:$0xff]   ;;  %s1603_s26 = scalar_lea.vmem %s1602_s25, 256 }
 0x1a8   : > { %v1239_v8 = vunpack.c.l.bf16 %v1238_v0  ;;  %v1240_v9 = vunpack.c.h.bf16 %v1238_v0  ;;  %p1605_p7 = scmp.lt.s32.totalorder %s1603_s26, %s1597_s10 }
 0x1aa   : > { %1415 = vmatpush3.bf16.msra.mxu1 %v1539_v55  ;;  %v1038_v11 = vrot.slane %v1239_v8, 1  ;;  %v1039_v12 = vrot.slane %v1240_v9, 1  ;;  %p1606_p8 = por %p1605_p7, %p1604_p4 }
 0x1ac   : > { %v1040_v18 = vsel %vm512_vm2, %v1038_v11, %v1039_v12  ;;  %v1042_v23 = vsel %vm512_vm2, %v1039_v12, %v1041_v15  ;;  %p1607_p11 = pnand %p1606_p8, %p1600_p3 }
 0x1ad   : > { %1417 = vmatmul.mubr.bf16.vlgmr.msra.gmra.mrb[8].mxu1 %v926_v59 }
 0x259   : > { %v896_v60 = vpop.f32.mrb[8].mxu0 }
 0x25a   : > { %v1398_v61 = vpop.f32.mrb[9].mxu0 }
 0x25b   : > { %v899_v62 = vpop.f32.mrb[10].mxu0 }
 0x25c   : > { %v1399_v63 = vpop.f32.mrb[11].mxu0 }
 0x260   : > { %v806_v1 = vpop.f32.mrb[4].mxu1 }
 0x261   : > { %v897_v2 = vadd.f32 %v896_v60, %v806_v1  ;;  %v1378_v3 = vpop.f32.mrb[5].mxu1 }
 0x262   : > { %v809_v4 = vpop.f32.mrb[6].mxu1 }
 0x263   : > { %v900_v5 = vadd.f32 %v899_v62, %v809_v4  ;;  %v1379_v6 = vpop.f32.mrb[7].mxu1 }
 0x280   : > { %v1010_v13 = vpop.f32.mrb[8].mxu1 }
 0x281   : > { %v1017_v16 = vadd.f32 %v1010_v13, %v897_v2  ;;  %v1418_v17 = vpop.f32.mrb[9].mxu1 }
 0x282   : > { %v1013_v19 = vpop.f32.mrb[10].mxu1 }
 0x283   : > { %v1032_v20 = vadd.f32 %v1224_v14, %v1017_v16  ;;  %v1018_v21 = vadd.f32 %v1013_v19, %v900_v5  ;;  %v1419_v22 = vpop.f32.mrb[11].mxu1 }
 0x285   : > { %v1045_v24 = vadd.f32 %v1040_v18, %v1032_v20  ;;  %v1033_v25 = vadd.f32 %v1224_v14, %v1018_v21 }
 0x287   : > { %v1046_v26 = vadd.f32 %v1042_v23, %v1033_v25  ;;  %v1047_v27 = vmax.f32 %v1045_v24, 0.0 }
 0x289   : > { %v1048_v28 = vmax.f32 %v1046_v26, 0.0 }
 0x28b   : > { %v1244_v29 = vpack.c.bf16 %v1048_v28, %v1047_v27 }
 0x28d   : > { %1245 = vst [vmem:[%s247_s17] sm:$0xff] %v1244_v29  }
 0x28e   : > { %1610 = shalt.err (!%p1607_p11)
}
 0x28f   : > { %s1611_s9 = scalar_lea.hbm %s1926_s30, 128  ;;  %s1615_s13 = scalar_lea.hbm %s1976_s5, 256 }
 0x290   : > { %p1612_p13 = scmp.ne.s32.totalorder %s1926_s30, %s1611_s9  ;;  %p1616_p6 = scmp.lt.u32.totalorder %s1926_s30, %s1976_s5 }
 0x291   : > { %p1617_p9 = scmp.lt.u32.totalorder %s1615_s13, %s1611_s9  ;;  %p1619_p10 = scmp.lt.u32.totalorder %s1611_s9, %s1926_s30 }
 0x292   : > { %p1613_p5 = pnand %p1612_p13, %p1989_p1 }
 0x293   : > { %p1618_p12 = por %p1617_p9, %p1616_p6 }
 0x294   : > { %p1614_p0 = pneg %p1613_p5 }
 0x295   : > { %p1620_p2 = por %p1619_p10, %p1618_p12 }
 0x297   : > { %p1621_p3 = pnand %p1620_p2, %p1614_p0 }
 0x299   : > { %1624 = shalt.err (!%p1621_p3)
}
 0x29a   : > { %s1676_s16 = smov 64   ;;  %s1677_s17 = smov 4  }
 0x29b   : > { %1429 = dma.vmem_to_hbm [thread:$0]  (%p1989_p1), %s1928_s7, 128, %s1926_s30, %s1930_s8, %s1676_s16, %s1676_s16, %s1677_s17  }
 0x29c PF: > { %p1446_p4 = scmp.ge.s32.totalorder %s1667_s21, 2  ;;  %s1088_s23 = sand.u32 1, %s1655_s18  }
 0x29d   : > { %p1990_p7 = scmp.ne.s32.totalorder %s1981_s29, 0  ;;  %s1089_s6 = scalar_lea.sflag [#allocation5], %s1088_s23 }
 0x29f   : > { %p1439_p8 = pnand %p1446_p4, %p1990_p7 }
 0x2a1   : > { %1650 = dma.done.wait (!%p1439_p8), %s1089_s6, 128  }
 0x2a2   : > { %1652 = vsyncadd (!%p1439_p8), %s1089_s6, 4294967168  ;;  %p17_p11 = scmp.ge.s32.totalorder %s1733_s24, 4   ;;  %s1991_s18 = smov %s1659_s19 }
 0x2a3   : > { %s1992_s19 = smov %s1663_s20  ;;  %s1993_s20 = smov %s1744_s27 }
 0x2a4   : > { %s1994_s21 = smov %s1733_s24  ;;  %19 = sbr.rel (!%p17_p11) target bundleno = 5 (0x5), region = 88 }
 0x2ab   :  { %1094 = vsyncpa [#allocation4], 1 }
 0x2ac   :  { %1096 = vsyncpa [#allocation4 + $0x1], 1 }
 0x2ad   :  { %1097 = vsyncpa [#allocation7], 1 }
 0x2ae   :  { %1098 = vsyncpa [#allocation5], 1 }
 0x2af   :  { %1100 = vsyncpa [#allocation5 + $0x1], 1 }

</bundles_post_ra>
